<compile_context>
chip_gen: v7x
topology: tpu7x:2x2x1
jax: 0.10.0
libtpu: 0.0.40
codegen_flags: <defaults>
</compile_context>

<pallas_src>
import jax
import jax.numpy as jnp
from jax.experimental import pallas as pl
from jax.experimental.pallas import tpu as pltpu

# ---- module hyperparameters (from generator/generator.py) ----
N_EMBD = 64
NUM_HEADS = 4
HEAD_SIZE = N_EMBD // NUM_HEADS   # 16
HD = NUM_HEADS * HEAD_SIZE        # 64
BLOCK_SIZE = 36                   # causal-mask capacity (T <= BLOCK_SIZE)
NEG_INF = -1e30


def mha_kernel(mask_ref, x_ref, wqkv_ref, wpt_ref, bp_ref, o_ref):
    """One block of Bb batch elements per grid step.

    mask_ref : (Tp, Tp)   f32   additive causal bias (pad columns already masked)
    x_ref    : (Bb*Tp, C) bf16  input rows for this block (pad rows are zeros)
    wqkv_ref : (C, 3*H*hs) bf16 fused [Q*sqrt(C) | K | V] projection, head-major cols
    wpt_ref  : (H*hs, C)  bf16  pre-transposed output projection
    bp_ref   : (1, C)     f32   output projection bias
    o_ref    : (Bb*Tp, C) f32   output rows
    """
    rows, C = x_ref.shape
    Tp = mask_ref.shape[0]
    Bb = rows // Tp

    x = x_ref[...]
    # One fused (rows, C) @ (C, 3*H*hs) bf16 matmul (f32 accumulation) for Q, K, V of
    # all heads.  Score scale is already folded into the Q columns by the wrapper.
    kqv = jnp.dot(x, wqkv_ref[...], preferred_element_type=jnp.float32)
    kqv = kqv.astype(jnp.bfloat16).reshape(Bb, Tp, 3 * HD)   # layout-free (Tp % 8 == 0)
    mask = mask_ref[...]                                     # (Tp, Tp)

    # Per-head QK^T on the MXU (static 4-way unroll, batched over Bb), stacked so the
    # softmax chain (mask-add / max / exp / sum / reciprocal) is issued exactly once.
    scores = []
    for h in range(NUM_HEADS):
        q = kqv[:, :, h * HEAD_SIZE:(h + 1) * HEAD_SIZE]
        k = kqv[:, :, HD + h * HEAD_SIZE:HD + (h + 1) * HEAD_SIZE]
        scores.append(jnp.einsum('btd,bsd->bts', q, k,
                                 preferred_element_type=jnp.float32))
    s = jnp.stack(scores, axis=1) + mask                     # (Bb, H, Tp, Tp), f32
    m = jnp.max(s, axis=-1, keepdims=True)
    e = jnp.exp(s - m)
    denom = jnp.sum(e, axis=-1, keepdims=True)
    p = (e * pl.reciprocal(denom, approx=True)).astype(jnp.bfloat16)  # EUP divide
    # dropout(p): identity in eval mode

    outs = []
    for h in range(NUM_HEADS):                               # only the matmuls per head
        v = kqv[:, :, 2 * HD + h * HEAD_SIZE:2 * HD + (h + 1) * HEAD_SIZE]
        outs.append(jnp.einsum('bts,bsd->btd', p[:, h], v,
                               preferred_element_type=jnp.float32))
    out_cat = jnp.concatenate(outs, axis=-1)                 # (Bb, Tp, H*hs)
    y = jnp.dot(out_cat.reshape(rows, HD).astype(jnp.bfloat16), wpt_ref[...],
                preferred_element_type=jnp.float32)          # one wide output proj
    o_ref[...] = y + bp_ref[...]       # + bias; final dropout = identity (eval)


def _pick_grid_steps(B: int) -> int:
    """Grid length: a divisor of B, >= min(B, 4) steps (>=2 per v7x TensorCore when B
    allows, so per-step DMA overlaps compute), and <= 16 batch elements per step so
    double-buffered blocks stay tiny vs. every chip's scoped-VMEM limit."""
    target = max(min(B, 4), -(-B // 16))
    g = target
    while B % g:
        g += 1
    return g


@jax.jit
def multi_head_attention(x, wk, wq, wv, wp, bp):
    B, T, C = x.shape
    assert T <= BLOCK_SIZE
    H, hs, _ = wk.shape
    scale = float(C) ** 0.5            # NOTE: module multiplies scores by sqrt(n_embd)
    Tp = ((T + 7) // 8) * 8            # pad seq length to a sublane multiple

    # ---- wrapper-side (free) layout plumbing --------------------------------
    def stack_t(w):                    # (H, hs, C) -> (C, H*hs), head-major columns
        return jnp.transpose(w, (2, 0, 1)).reshape(C, H * hs)

    w_qkv = jnp.concatenate([stack_t(wq) * scale, stack_t(wk), stack_t(wv)],
                            axis=1).astype(jnp.bfloat16)                  # (C, 3*H*hs)
    wp_t = wp.T.astype(jnp.bfloat16)                                      # (H*hs, C)
    bp2 = bp.reshape(1, C).astype(jnp.float32)
    tri = jnp.tril(jnp.ones((Tp, Tp), dtype=jnp.bool_))
    mask = jnp.where(tri, 0.0, NEG_INF).astype(jnp.float32)   # pad key cols masked too
    x_p = jnp.pad(x, ((0, 0), (0, Tp - T), (0, 0)))           # zero pad rows
    x2 = x_p.reshape(B * Tp, C).astype(jnp.bfloat16)

    # ---- grid: scale with B, keep per-step blocks modest ---------------------
    gsize = _pick_grid_steps(B)
    Bb = B // gsize
    rows_blk = Bb * Tp

    flops = (2 * B * Tp * C * (3 * H * hs)      # fused QKV projection
             + 4 * B * H * Tp * Tp * hs         # scores + probs @ V
             + 2 * B * Tp * (H * hs) * C)       # output projection
    transcendentals = B * H * Tp * Tp + B * H * Tp
    bytes_accessed = (2 * B * Tp * C            # bf16 x in
                      + 4 * B * Tp * C          # f32 out
                      + 2 * (C * 3 * H * hs + H * hs * C)
                      + 4 * (C + Tp * Tp))

    out2 = pl.pallas_call(
        mha_kernel,
        out_shape=jax.ShapeDtypeStruct((B * Tp, C), jnp.float32),
        grid_spec=pltpu.PrefetchScalarGridSpec(
            num_scalar_prefetch=0,
            grid=(gsize,),
            in_specs=[
                pl.BlockSpec((Tp, Tp), lambda b: (0, 0)),
                pl.BlockSpec((rows_blk, C), lambda b: (b, 0)),
                pl.BlockSpec((C, 3 * H * hs), lambda b: (0, 0)),
                pl.BlockSpec((H * hs, C), lambda b: (0, 0)),
                pl.BlockSpec((1, C), lambda b: (0, 0)),
            ],
            out_specs=pl.BlockSpec((rows_blk, C), lambda b: (b, 0)),
        ),
        compiler_params=pltpu.CompilerParams(
            dimension_semantics=("parallel",)),
        cost_estimate=pl.CostEstimate(
            flops=flops, transcendentals=transcendentals,
            bytes_accessed=bytes_accessed),
    )(mask, x2, w_qkv, wp_t, bp2)
    return out2.reshape(B, Tp, C)[:, :T, :]


def reference(x, wk, wq, wv, wp, bp):
    """Pure-JAX f32 reference mirroring the PyTorch forward (eval mode)."""
    B, T, C = x.shape
    outs = []
    tril = jnp.tril(jnp.ones((T, T)))
    for h in range(NUM_HEADS):
        k = x @ wk[h].T
        q = x @ wq[h].T
        v = x @ wv[h].T
        wei = (q @ jnp.swapaxes(k, -2, -1)) * (C ** 0.5)
        wei = jnp.where(tril == 0, -jnp.inf, wei)
        wei = jax.nn.softmax(wei, axis=-1)
        outs.append(wei @ v)
    cat = jnp.concatenate(outs, axis=-1)
    return cat @ wp.T + bp


if __name__ == "__main__":
    key = jax.random.PRNGKey(0)
    kx, kk, kq, kv, kp, kb = jax.random.split(key, 6)

    B, T = 2, 12  # T <= block_size (36); exercises the pad-to-multiple-of-8 path
    x = jax.random.normal(kx, (B, T, N_EMBD), dtype=jnp.float32)

    # deterministic parameter init (synthetic weights, no checkpoint load)
    s_in = 1.0 / (N_EMBD ** 0.5)
    wk = jax.random.uniform(kk, (NUM_HEADS, HEAD_SIZE, N_EMBD), jnp.float32, -s_in, s_in)
    wq = jax.random.uniform(kq, (NUM_HEADS, HEAD_SIZE, N_EMBD), jnp.float32, -s_in, s_in)
    wv = jax.random.uniform(kv, (NUM_HEADS, HEAD_SIZE, N_EMBD), jnp.float32, -s_in, s_in)
    s_pr = 1.0 / ((NUM_HEADS * HEAD_SIZE) ** 0.5)
    wp = jax.random.uniform(kp, (N_EMBD, NUM_HEADS * HEAD_SIZE), jnp.float32, -s_pr, s_pr)
    bp = jax.random.uniform(kb, (N_EMBD,), jnp.float32, -s_pr, s_pr)

    out = multi_head_attention(x, wk, wq, wv, wp, bp)
    out = jax.block_until_ready(out)

    ref = reference(x, wk, wq, wv, wp, bp)
    assert out.shape == (B, T, N_EMBD)
    # Tolerance reflects bf16 operands (f32 accumulation) + approx reciprocal, per the
    # performance review; f32-operand runs matched the reference at 2e-3.
    assert jnp.allclose(out, ref, atol=3e-2, rtol=3e-2), "mismatch vs reference"
    print("KERNEL_OK")
</pallas_src>

<mosaic_0001>
module attributes {stable_mosaic.version = 11 : i64} {
  func.func @mha_kernel(%arg0: i32, %arg1: memref<16x16xf32, #tpu.memory_space<vmem>>, %arg2: memref<16x64xbf16, #tpu.memory_space<vmem>>, %arg3: memref<64x192xbf16, #tpu.memory_space<vmem>>, %arg4: memref<64x64xbf16, #tpu.memory_space<vmem>>, %arg5: memref<1x64xf32, #tpu.memory_space<vmem>>, %arg6: memref<16x64xf32, #tpu.memory_space<vmem>>) attributes {dimension_semantics = [#tpu.dimension_semantics<parallel>], iteration_bounds = array<i64: 2>, scalar_prefetch = 0 : i64, scratch_operands = 0 : i64, tpu.core_type = #tpu.core_type<tc>, window_params = [{pipeline_mode = #tpu.pipeline_mode<synchronous>, transform_indices = @transform_0, window_bounds = array<i64: 16, 16>}, {transform_indices = @transform_1, window_bounds = array<i64: 16, 64>}, {pipeline_mode = #tpu.pipeline_mode<synchronous>, transform_indices = @transform_2, window_bounds = array<i64: 64, 192>}, {pipeline_mode = #tpu.pipeline_mode<synchronous>, transform_indices = @transform_3, window_bounds = array<i64: 64, 64>}, {pipeline_mode = #tpu.pipeline_mode<synchronous>, transform_indices = @transform_4, window_bounds = array<i64: 1, 64>}, {transform_indices = @transform_5, window_bounds = array<i64: 16, 64>}]} {
    %c0 = arith.constant 0 : index
    %c0_0 = arith.constant 0 : index
    %0 = vector.load %arg2[%c0, %c0_0] : memref<16x64xbf16, #tpu.memory_space<vmem>>, vector<16x64xbf16>
    %c0_1 = arith.constant 0 : index
    %c0_2 = arith.constant 0 : index
    %1 = vector.load %arg3[%c0_1, %c0_2] : memref<64x192xbf16, #tpu.memory_space<vmem>>, vector<64x192xbf16>
    %cst = arith.constant dense<0.000000e+00> : vector<16x192xf32>
    %2 = tpu.matmul %0, %1, %cst {dimension_numbers = #tpu.dot_dimension_numbers<[1], [0], [0], [1], [0, 0, 1, 1], [], []>} : vector<16x64xbf16>, vector<64x192xbf16>, vector<16x192xf32> -> vector<16x192xf32>
    %3 = arith.truncf %2 : vector<16x192xf32> to vector<16x192xbf16>
    %4 = vector.shape_cast %3 : vector<16x192xbf16> to vector<1x16x192xbf16>
    %c0_3 = arith.constant 0 : index
    %c0_4 = arith.constant 0 : index
    %5 = vector.load %arg1[%c0_3, %c0_4] : memref<16x16xf32, #tpu.memory_space<vmem>>, vector<16x16xf32>
    %6 = vector.extract_strided_slice %4 {offsets = [0, 0, 0], sizes = [1, 16, 16], strides = [1, 1, 1]} : vector<1x16x192xbf16> to vector<1x16x16xbf16>
    %7 = vector.extract_strided_slice %4 {offsets = [0, 0, 64], sizes = [1, 16, 16], strides = [1, 1, 1]} : vector<1x16x192xbf16> to vector<1x16x16xbf16>
    "tpu.trace_start"() <{level = 10 : i32, message = "btd,bsd->bts"}> : () -> ()
    %cst_5 = arith.constant dense<0.000000e+00> : vector<1x16x16xf32>
    %8 = tpu.matmul %6, %7, %cst_5 {dimension_numbers = #tpu.dot_dimension_numbers<[2], [2], [1], [1], [0, 0, 0, 1, 1, 1], [0], [0]>} : vector<1x16x16xbf16>, vector<1x16x16xbf16>, vector<1x16x16xf32> -> vector<1x16x16xf32>
    "tpu.trace_stop"() : () -> ()
    %9 = vector.extract_strided_slice %4 {offsets = [0, 0, 16], sizes = [1, 16, 16], strides = [1, 1, 1]} : vector<1x16x192xbf16> to vector<1x16x16xbf16>
    %10 = vector.extract_strided_slice %4 {offsets = [0, 0, 80], sizes = [1, 16, 16], strides = [1, 1, 1]} : vector<1x16x192xbf16> to vector<1x16x16xbf16>
    "tpu.trace_start"() <{level = 10 : i32, message = "btd,bsd->bts"}> : () -> ()
    %cst_6 = arith.constant dense<0.000000e+00> : vector<1x16x16xf32>
    %11 = tpu.matmul %9, %10, %cst_6 {dimension_numbers = #tpu.dot_dimension_numbers<[2], [2], [1], [1], [0, 0, 0, 1, 1, 1], [0], [0]>} : vector<1x16x16xbf16>, vector<1x16x16xbf16>, vector<1x16x16xf32> -> vector<1x16x16xf32>
    "tpu.trace_stop"() : () -> ()
    %12 = vector.extract_strided_slice %4 {offsets = [0, 0, 32], sizes = [1, 16, 16], strides = [1, 1, 1]} : vector<1x16x192xbf16> to vector<1x16x16xbf16>
    %13 = vector.extract_strided_slice %4 {offsets = [0, 0, 96], sizes = [1, 16, 16], strides = [1, 1, 1]} : vector<1x16x192xbf16> to vector<1x16x16xbf16>
    "tpu.trace_start"() <{level = 10 : i32, message = "btd,bsd->bts"}> : () -> ()
    %cst_7 = arith.constant dense<0.000000e+00> : vector<1x16x16xf32>
    %14 = tpu.matmul %12, %13, %cst_7 {dimension_numbers = #tpu.dot_dimension_numbers<[2], [2], [1], [1], [0, 0, 0, 1, 1, 1], [0], [0]>} : vector<1x16x16xbf16>, vector<1x16x16xbf16>, vector<1x16x16xf32> -> vector<1x16x16xf32>
    "tpu.trace_stop"() : () -> ()
    %15 = vector.extract_strided_slice %4 {offsets = [0, 0, 48], sizes = [1, 16, 16], strides = [1, 1, 1]} : vector<1x16x192xbf16> to vector<1x16x16xbf16>
    %16 = vector.extract_strided_slice %4 {offsets = [0, 0, 112], sizes = [1, 16, 16], strides = [1, 1, 1]} : vector<1x16x192xbf16> to vector<1x16x16xbf16>
    "tpu.trace_start"() <{level = 10 : i32, message = "btd,bsd->bts"}> : () -> ()
    %cst_8 = arith.constant dense<0.000000e+00> : vector<1x16x16xf32>
    %17 = tpu.matmul %15, %16, %cst_8 {dimension_numbers = #tpu.dot_dimension_numbers<[2], [2], [1], [1], [0, 0, 0, 1, 1, 1], [0], [0]>} : vector<1x16x16xbf16>, vector<1x16x16xbf16>, vector<1x16x16xf32> -> vector<1x16x16xf32>
    "tpu.trace_stop"() : () -> ()
    %18 = vector.shape_cast %8 : vector<1x16x16xf32> to vector<1x1x16x16xf32>
    %19 = vector.shape_cast %11 : vector<1x16x16xf32> to vector<1x1x16x16xf32>
    %20 = vector.shape_cast %14 : vector<1x16x16xf32> to vector<1x1x16x16xf32>
    %21 = vector.shape_cast %17 : vector<1x16x16xf32> to vector<1x1x16x16xf32>
    %22 = tpu.concatenate %18, %19, %20, %21 in 1 : vector<1x1x16x16xf32>, vector<1x1x16x16xf32>, vector<1x1x16x16xf32>, vector<1x1x16x16xf32> -> vector<1x4x16x16xf32>
    %23 = vector.shape_cast %5 : vector<16x16xf32> to vector<1x1x16x16xf32>
    %24 = vector.broadcast %23 : vector<1x1x16x16xf32> to vector<1x4x16x16xf32>
    %25 = arith.addf %22, %24 : vector<1x4x16x16xf32>
    %cst_9 = arith.constant dense<0xFF800000> : vector<1x4x16xf32>
    %26 = vector.multi_reduction <maximumf>, %25, %cst_9 [3] : vector<1x4x16x16xf32> to vector<1x4x16xf32>
    %27 = vector.shape_cast %26 : vector<1x4x16xf32> to vector<1x4x16x1xf32>
    %28 = vector.broadcast %27 : vector<1x4x16x1xf32> to vector<1x4x16x16xf32>
    %29 = arith.subf %25, %28 : vector<1x4x16x16xf32>
    %30 = math.exp %29 : vector<1x4x16x16xf32>
    %cst_10 = arith.constant dense<0.000000e+00> : vector<1x4x16xf32>
    %31 = vector.multi_reduction <add>, %30, %cst_10 [3] : vector<1x4x16x16xf32> to vector<1x4x16xf32>
    %32 = vector.shape_cast %31 : vector<1x4x16xf32> to vector<1x4x16x1xf32>
    %33 = tpu.reciprocal %32 {approx = true} : vector<1x4x16x1xf32> -> vector<1x4x16x1xf32>
    %34 = vector.broadcast %33 : vector<1x4x16x1xf32> to vector<1x4x16x16xf32>
    %35 = arith.mulf %30, %34 : vector<1x4x16x16xf32>
    %36 = arith.truncf %35 : vector<1x4x16x16xf32> to vector<1x4x16x16xbf16>
    %37 = vector.extract_strided_slice %4 {offsets = [0, 0, 128], sizes = [1, 16, 16], strides = [1, 1, 1]} : vector<1x16x192xbf16> to vector<1x16x16xbf16>
    %38 = vector.extract_strided_slice %36 {offsets = [0, 0, 0, 0], sizes = [1, 1, 16, 16], strides = [1, 1, 1, 1]} : vector<1x4x16x16xbf16> to vector<1x1x16x16xbf16>
    %39 = vector.shape_cast %38 : vector<1x1x16x16xbf16> to vector<1x16x16xbf16>
    "tpu.trace_start"() <{level = 10 : i32, message = "bts,bsd->btd"}> : () -> ()
    %cst_11 = arith.constant dense<0.000000e+00> : vector<1x16x16xf32>
    %40 = tpu.matmul %39, %37, %cst_11 {dimension_numbers = #tpu.dot_dimension_numbers<[2], [1], [1], [2], [0, 0, 0, 1, 1, 2], [0], [0]>} : vector<1x16x16xbf16>, vector<1x16x16xbf16>, vector<1x16x16xf32> -> vector<1x16x16xf32>
    "tpu.trace_stop"() : () -> ()
    %41 = vector.extract_strided_slice %4 {offsets = [0, 0, 144], sizes = [1, 16, 16], strides = [1, 1, 1]} : vector<1x16x192xbf16> to vector<1x16x16xbf16>
    %42 = vector.extract_strided_slice %36 {offsets = [0, 1, 0, 0], sizes = [1, 1, 16, 16], strides = [1, 1, 1, 1]} : vector<1x4x16x16xbf16> to vector<1x1x16x16xbf16>
    %43 = vector.shape_cast %42 : vector<1x1x16x16xbf16> to vector<1x16x16xbf16>
    "tpu.trace_start"() <{level = 10 : i32, message = "bts,bsd->btd"}> : () -> ()
    %cst_12 = arith.constant dense<0.000000e+00> : vector<1x16x16xf32>
    %44 = tpu.matmul %43, %41, %cst_12 {dimension_numbers = #tpu.dot_dimension_numbers<[2], [1], [1], [2], [0, 0, 0, 1, 1, 2], [0], [0]>} : vector<1x16x16xbf16>, vector<1x16x16xbf16>, vector<1x16x16xf32> -> vector<1x16x16xf32>
    "tpu.trace_stop"() : () -> ()
    %45 = vector.extract_strided_slice %4 {offsets = [0, 0, 160], sizes = [1, 16, 16], strides = [1, 1, 1]} : vector<1x16x192xbf16> to vector<1x16x16xbf16>
    %46 = vector.extract_strided_slice %36 {offsets = [0, 2, 0, 0], sizes = [1, 1, 16, 16], strides = [1, 1, 1, 1]} : vector<1x4x16x16xbf16> to vector<1x1x16x16xbf16>
    %47 = vector.shape_cast %46 : vector<1x1x16x16xbf16> to vector<1x16x16xbf16>
    "tpu.trace_start"() <{level = 10 : i32, message = "bts,bsd->btd"}> : () -> ()
    %cst_13 = arith.constant dense<0.000000e+00> : vector<1x16x16xf32>
    %48 = tpu.matmul %47, %45, %cst_13 {dimension_numbers = #tpu.dot_dimension_numbers<[2], [1], [1], [2], [0, 0, 0, 1, 1, 2], [0], [0]>} : vector<1x16x16xbf16>, vector<1x16x16xbf16>, vector<1x16x16xf32> -> vector<1x16x16xf32>
    "tpu.trace_stop"() : () -> ()
    %49 = vector.extract_strided_slice %4 {offsets = [0, 0, 176], sizes = [1, 16, 16], strides = [1, 1, 1]} : vector<1x16x192xbf16> to vector<1x16x16xbf16>
    %50 = vector.extract_strided_slice %36 {offsets = [0, 3, 0, 0], sizes = [1, 1, 16, 16], strides = [1, 1, 1, 1]} : vector<1x4x16x16xbf16> to vector<1x1x16x16xbf16>
    %51 = vector.shape_cast %50 : vector<1x1x16x16xbf16> to vector<1x16x16xbf16>
    "tpu.trace_start"() <{level = 10 : i32, message = "bts,bsd->btd"}> : () -> ()
    %cst_14 = arith.constant dense<0.000000e+00> : vector<1x16x16xf32>
    %52 = tpu.matmul %51, %49, %cst_14 {dimension_numbers = #tpu.dot_dimension_numbers<[2], [1], [1], [2], [0, 0, 0, 1, 1, 2], [0], [0]>} : vector<1x16x16xbf16>, vector<1x16x16xbf16>, vector<1x16x16xf32> -> vector<1x16x16xf32>
    "tpu.trace_stop"() : () -> ()
    %53 = tpu.concatenate %40, %44, %48, %52 in 2 : vector<1x16x16xf32>, vector<1x16x16xf32>, vector<1x16x16xf32>, vector<1x16x16xf32> -> vector<1x16x64xf32>
    %54 = vector.shape_cast %53 : vector<1x16x64xf32> to vector<16x64xf32>
    %55 = arith.truncf %54 : vector<16x64xf32> to vector<16x64xbf16>
    %c0_15 = arith.constant 0 : index
    %c0_16 = arith.constant 0 : index
    %56 = vector.load %arg4[%c0_15, %c0_16] : memref<64x64xbf16, #tpu.memory_space<vmem>>, vector<64x64xbf16>
    %cst_17 = arith.constant dense<0.000000e+00> : vector<16x64xf32>
    %57 = tpu.matmul %55, %56, %cst_17 {dimension_numbers = #tpu.dot_dimension_numbers<[1], [0], [0], [1], [0, 0, 1, 1], [], []>} : vector<16x64xbf16>, vector<64x64xbf16>, vector<16x64xf32> -> vector<16x64xf32>
    %c0_18 = arith.constant 0 : index
    %c0_19 = arith.constant 0 : index
    %58 = vector.load %arg5[%c0_18, %c0_19] : memref<1x64xf32, #tpu.memory_space<vmem>>, vector<1x64xf32>
    %59 = vector.broadcast %58 : vector<1x64xf32> to vector<16x64xf32>
    %60 = arith.addf %57, %59 : vector<16x64xf32>
    %c0_20 = arith.constant 0 : index
    %c0_21 = arith.constant 0 : index
    %61 = vector.load %arg6[%c0_20, %c0_21] : memref<16x64xf32, #tpu.memory_space<vmem>>, vector<16x64xf32>
    tpu.vector_store %arg6[%c0_20, %c0_21], %60 {strides = array<i32>} : memref<16x64xf32, #tpu.memory_space<vmem>>, vector<16x64xf32>,
    return
  }
  func.func @transform_0(%arg0: i32) -> (i32, i32) {
    %c0_i32 = arith.constant 0 : i32
    %c0_i32_0 = arith.constant 0 : i32
    %c0_i32_1 = arith.constant 0 : i32
    return %c0_i32, %c0_i32_0 : i32, i32
  }
  func.func @transform_1(%arg0: i32) -> (i32, i32) {
    %c0_i32 = arith.constant 0 : i32
    %c0_i32_0 = arith.constant 0 : i32
    return %arg0, %c0_i32 : i32, i32
  }
  func.func @transform_2(%arg0: i32) -> (i32, i32) {
    %c0_i32 = arith.constant 0 : i32
    %c0_i32_0 = arith.constant 0 : i32
    %c0_i32_1 = arith.constant 0 : i32
    return %c0_i32, %c0_i32_0 : i32, i32
  }
  func.func @transform_3(%arg0: i32) -> (i32, i32) {
    %c0_i32 = arith.constant 0 : i32
    %c0_i32_0 = arith.constant 0 : i32
    %c0_i32_1 = arith.constant 0 : i32
    return %c0_i32, %c0_i32_0 : i32, i32
  }
  func.func @transform_4(%arg0: i32) -> (i32, i32) {
    %c0_i32 = arith.constant 0 : i32
    %c0_i32_0 = arith.constant 0 : i32
    %c0_i32_1 = arith.constant 0 : i32
    return %c0_i32, %c0_i32_0 : i32, i32
  }
  func.func @transform_5(%arg0: i32) -> (i32, i32) {
    %c0_i32 = arith.constant 0 : i32
    %c0_i32_0 = arith.constant 0 : i32
    return %arg0, %c0_i32 : i32, i32
  }
}

</mosaic_0001>

<bundles_post_ra>
// kernel: multi_head_attention.1
= control target key start
LH: loop header
LB: loop body
LE: loop exit
PB: predicated region body
PF: predicated region fallthrough
CT: control target
= control target key end

     0   :  { %s1245_s18 = smov 0   ;;  %s1393_s0 = inlined_call_operand.vmem [shape: f32[16,16], index: 0, kind: input, shape index: {}]   ;;  %s1394_s1 = inlined_call_operand.vmem [shape: bf16[32,64], index: 1, kind: input, shape index: {}]   ;;  %s1395_s2 = inlined_call_operand.vmem [shape: bf16[64,192], index: 2, kind: input, shape index: {}]   ;;  %s1396_s3 = inlined_call_operand.vmem [shape: bf16[64,64], index: 3, kind: input, shape index: {}]   ;;  %s1397_s4 = inlined_call_operand.vmem [shape: f32[1,64], index: 4, kind: input, shape index: {}]   ;;  %s1398_s5 = inlined_call_operand.vmem [shape: f32[32,64], index: 5, kind: output, shape index: {}]  }
   0x1 LB: > { %s999_s19 = sadd.s32 4294967295, %s1203_s18   ;;  %p1003_p0 = scmp.ge.s32.totalorder %s1203_s18, 1  ;;  %s1203_s18 = sphi %s1245_s18, %s15_s18  }
   0x2   : > { %p188_p1 = scmp.lt.s32.totalorder %s1203_s18, 3 }
   0x4   : > { %p189_p2 = pnand %p1003_p0, %p188_p1 }
   0x5   : > { %v1148_v0 = vld [vmem:[%s1395_s2 + $0x4] ss:$8 sps:$4 sm:$0xff] (!%p189_p2)   ;;  %s1004_s22 = sshll.u32 (!%p189_p2), %s999_s19, 1  ;;  %v1150_v1 = vld [vmem:[%s1395_s2] ss:$8 sps:$4 sm:$0xff] (!%p189_p2)   ;;  %v1205_v2 = vmov (!%p189_p2), 0  }
   0x6   : > { %192 = sbr.rel (%p189_p2) target bundleno = 1515 (0x5eb), region = 40  ;;  %320 = vmatprep.mubr.bf16.mxu0 (!%p189_p2), %v1205_v2  ;;  %p217_p3 = scmp.lt.s32.totalorder (!%p189_p2), %s1004_s22, 3  ;;  %288 = vmatprep.subr.bf16.mxu0 (!%p189_p2), %v1148_v0  ;;  %v1151_v3 = vld [vmem:[%s1395_s2 + $0x14] ss:$8 sps:$4 sm:$0xff] (!%p189_p2)   ;;  %v1153_v4 = vld [vmem:[%s1395_s2 + $0x10] ss:$8 sps:$4 sm:$0xff] (!%p189_p2)  }
   0x7   : > { %289 = vmatpush1.bf16.msra.mxu0 (!%p189_p2), %v1150_v1  ;;  %v1154_v5 = vld [vmem:[%s1395_s2 + $0x24] ss:$8 sps:$4 sm:$0xff] (!%p189_p2)   ;;  %v1156_v6 = vld [vmem:[%s1395_s2 + $0x20] ss:$8 sps:$4 sm:$0xff] (!%p189_p2)   ;;  %v1157_v7 = vld [vmem:[%s1395_s2 + $0x34] ss:$8 sps:$4 sm:$0xff] (!%p189_p2)  }
   0x8   : > { %290 = vmatprep.subr.bf16.mxu0 (!%p189_p2), %v1151_v3  ;;  %v1159_v8 = vld [vmem:[%s1395_s2 + $0x30] ss:$8 sps:$4 sm:$0xff] (!%p189_p2)   ;;  %vm284_vm0 = vcmask (!%p189_p2), 523264   ;;  %v1206_v10 = vmov (!%p189_p2), 0.0   ;;  %vm1207_vm1 = vmmov (!%p189_p2), 0   ;;  %s1208_s16 = smov (!%p189_p2), 112  }
   0x9   : > { %1055 = vmatprep.subr.bf16.mxu1 (!%p189_p2), %v1206_v10  ;;  %1057 = vmatprep.mubr.msk.bf16.mxu1 (!%p189_p2), %vm1207_vm1, %v1206_v10  ;;  %s1209_s17 = smov (!%p189_p2), 64   ;;  %s1210_s19 = smov (!%p189_p2), 32   ;;  %vm338_vm2 = vcmask (!%p189_p2), 130048   ;;  %v333_v28 = vld [vmem:[%s1393_s0] sm:$0xff] (!%p189_p2)  ;;  %v334_v30 = vld [vmem:[%s1393_s0 + $0x8] sm:$0xff] (!%p189_p2)  ;;  %vm851_vm3 = vcmask (!%p189_p2), 261120  }
   0xa   : > { %s1211_s20 = smov (!%p189_p2), 48   ;;  %s1212_s21 = smov (!%p189_p2), 16   ;;  %vm854_vm4 = vcmask (!%p189_p2), 392192  }
   0xb   : > { %291 = vmatpush1.bf16.msra.mxu0 (!%p189_p2), %v1153_v4  ;;  %s1213_s23 = smov (!%p189_p2), 96   ;;  %s1214_s24 = smov (!%p189_p2), 80  }
   0xc   : > { %292 = vmatprep.subr.bf16.mxu0 (!%p189_p2), %v1154_v5 }
   0xd   : > { %s1400_s22 = smov (!%p217_p3, %s1004_s22), 3 }
   0xe   : > { %s1005_s8 = sshll.u32 %s1400_s22, 2  ;;  %s1007_s12 = sshll.u32 %s1400_s22, 3 }
   0xf   : > { %s220_s11 = scalar_lea.vmem %s1394_s1, %s1005_s8  ;;  %293 = vmatpush1.bf16.msra.mxu0 %v1156_v6 }
  0x10   : > { %294 = vmatprep.subr.bf16.mxu0 %v1157_v7  ;;  %v1160_v9 = vld [vmem:[%s220_s11] sm:$0xff]  }
  0x13   : > { %295 = vmatpush1.bf16.msra.mxu0 %v1159_v8 }
  0x14   : > { %1079 = vmatprep.subr.bf16.mxu0 %v1206_v10 }
  0x16   : > { %1017 = vmatmul.mubr.msk.bf16.vlgmr.msra.gmra.mrb[0].mxu0 %vm284_vm0, %v1160_v9 }
  0x17   : > { %1081 = vmatprep.mubr.msk.bf16.mxu0 %vm1207_vm1, %v1206_v10 }
  0xe9   : > { %v322_v11 = vpop.f32.mrb[0].mxu0 }
  0xea   : > { %v324_v12 = vpop.f32.mrb[1].mxu0 }
  0xeb   : > { %v326_v13 = vpop.f32.mrb[2].mxu0 }
  0xec   : > { %v331_v14 = vpack.c.bf16 %v326_v13, %v322_v11  ;;  %v328_v15 = vpop.f32.mrb[3].mxu0 }
  0xed   : > { %v1290_v16 = vpack.c.bf16 %v328_v15, %v324_v12 }
  0xee   : > { %386 = vrot.lane.b32.xlu1 %v331_v14, %s1208_s16  ;;  %336 = vrot.lane.b32.xlu0 %v331_v14, %s1209_s17  ;;  %s226_s17 = scalar_lea.vmem %s1398_s5, %s1007_s12 }
  0xef   : > { %1080 = vmatpush3.bf16.msra.mxu0 %v1290_v16 }
  0xf0   : > { %1091 = vmatprep.subr.bf16.mxu0 %v1206_v10 }
  0xf2   : > { %439 = vrot.lane.b32.xlu1 %v331_v14, %s1210_s19  ;;  %388 = vrot.lane.b32.xlu0 %v331_v14, %s1211_s20 }
  0xf6   : > { %490 = vrot.lane.b32.xlu1 %v331_v14, %s1212_s21  ;;  %437 = vrot.lane.b32.xlu0 %v331_v14, %s1213_s23 }
  0xfa   : > { %488 = vrot.lane.b32.xlu0 %v331_v14, %s1214_s24 }
 0x160   : > { %v337_v17 = vpop.permute.xlu0 %336  ;;  %v387_v20 = vpop.permute.xlu1 %386 }
 0x161   : > { %v343_v18 = vsel %vm338_vm2, %v337_v17, 0 }
 0x162   : > { %1056 = vmatpush3.bf16.xpose.msra.mxu1 %v343_v18 }
 0x163   : > { %1061 = vmatprep.subr.bf16.mxu1 %v1206_v10 }
 0x164   : > { %v389_v19 = vpop.permute.xlu0 %388  ;;  %v440_v22 = vpop.permute.xlu1 %439 }
 0x165   : > { %v394_v21 = vsel %vm338_vm2, %v389_v19, 0  ;;  %v445_v23 = vsel %vm338_vm2, %v440_v22, 0 }
 0x168   : > { %v491_v24 = vpop.permute.xlu1 %490  ;;  %v438_v25 = vpop.permute.xlu0 %437 }
 0x169   : > { %1058 = vmatmul.mubr.msk.bf16.vlgmr.msra.gmra.mrb[0].mxu1 %vm338_vm2, %v331_v14  ;;  %v496_v26 = vsel %vm338_vm2, %v491_v24, 0 }
 0x16a   : > { %1062 = vmatpush3.bf16.xpose.msra.mxu1 %v394_v21  ;;  %1063 = vmatprep.mubr.msk.bf16.mxu1 %vm1207_vm1, %v1206_v10 }
 0x16b   : > { %1067 = vmatprep.subr.bf16.mxu1 %v1206_v10 }
 0x16c   : > { %v489_v27 = vpop.permute.xlu0 %488 }
 0x171   : > { %1064 = vmatmul.mubr.msk.bf16.vlgmr.msra.gmra.mrb[4].mxu1 %vm338_vm2, %v387_v20 }
 0x172   : > { %1068 = vmatpush3.bf16.xpose.msra.mxu1 %v445_v23  ;;  %1069 = vmatprep.mubr.msk.bf16.mxu1 %vm1207_vm1, %v1206_v10 }
 0x173   : > { %1073 = vmatprep.subr.bf16.mxu1 %v1206_v10 }
 0x179   : > { %1070 = vmatmul.mubr.msk.bf16.vlgmr.msra.gmra.mrb[8].mxu1 %vm338_vm2, %v438_v25 }
 0x17a   : > { %1074 = vmatpush3.bf16.xpose.msra.mxu1 %v496_v26  ;;  %1075 = vmatprep.mubr.msk.bf16.mxu1 %vm1207_vm1, %v1206_v10 }
 0x17b   : > { %1085 = vmatprep.subr.bf16.mxu1 %v1206_v10 }
 0x181   : > { %1076 = vmatmul.mubr.msk.bf16.vlgmr.msra.gmra.mrb[12].mxu1 %vm338_vm2, %v489_v27 }
 0x182   : > { %1087 = vmatprep.mubr.msk.bf16.mxu1 %vm1207_vm1, %v1206_v10 }
 0x23c   : > { %v379_v29 = vpop.f32.mrb[0].mxu1 }
 0x23d   : > { %v539_v31 = vadd.f32 %v379_v29, %v333_v28  ;;  %v1059_v32 = vpop.f32.mrb[1].mxu1 }
 0x23e   : > { %v382_v33 = vpop.f32.mrb[2].mxu1 }
 0x23f   : > { %v540_v34 = vadd.f32 %v382_v33, %v334_v30  ;;  %v1060_v35 = vpop.f32.mrb[3].mxu1  ;;  %v547_v36 = vsel %vm338_vm2, %v539_v31, -inf }
 0x240   : > { %548 = vmax.xlane.f32.xlu1 %v547_v36 }
 0x241   : > { %v550_v37 = vsel %vm338_vm2, %v540_v34, -inf }
 0x242   : > { %551 = vmax.xlane.f32.xlu0 %v550_v37 }
 0x244   : > { %v430_v38 = vpop.f32.mrb[4].mxu1 }
 0x245   : > { %v541_v39 = vadd.f32 %v430_v38, %v333_v28  ;;  %v1065_v40 = vpop.f32.mrb[5].mxu1 }
 0x246   : > { %v433_v41 = vpop.f32.mrb[6].mxu1 }
 0x247   : > { %v542_v42 = vadd.f32 %v433_v41, %v334_v30  ;;  %v1066_v43 = vpop.f32.mrb[7].mxu1  ;;  %v553_v44 = vsel %vm338_vm2, %v541_v39, -inf }
 0x248   : > { %554 = vmax.xlane.f32.xlu0 %v553_v44 }
 0x249   : > { %v556_v45 = vsel %vm338_vm2, %v542_v42, -inf }
 0x24a   : > { %557 = vmax.xlane.f32.xlu1 %v556_v45 }
 0x24c   : > { %v481_v46 = vpop.f32.mrb[8].mxu1 }
 0x24d   : > { %v543_v47 = vadd.f32 %v481_v46, %v333_v28  ;;  %v1071_v48 = vpop.f32.mrb[9].mxu1 }
 0x24e   : > { %v484_v49 = vpop.f32.mrb[10].mxu1 }
 0x24f   : > { %v544_v50 = vadd.f32 %v484_v49, %v334_v30  ;;  %v1072_v51 = vpop.f32.mrb[11].mxu1  ;;  %v559_v52 = vsel %vm338_vm2, %v543_v47, -inf }
 0x250   : > { %560 = vmax.xlane.f32.xlu0 %v559_v52 }
 0x251   : > { %v562_v53 = vsel %vm338_vm2, %v544_v50, -inf }
 0x252   : > { %563 = vmax.xlane.f32.xlu1 %v562_v53 }
 0x254   : > { %v532_v54 = vpop.f32.mrb[12].mxu1 }
 0x255   : > { %v545_v55 = vadd.f32 %v532_v54, %v333_v28  ;;  %v1077_v56 = vpop.f32.mrb[13].mxu1 }
 0x256   : > { %v535_v57 = vpop.f32.mrb[14].mxu1 }
 0x257   : > { %v546_v58 = vadd.f32 %v535_v57, %v334_v30  ;;  %v1078_v59 = vpop.f32.mrb[15].mxu1  ;;  %v565_v60 = vsel %vm338_vm2, %v545_v55, -inf }
 0x258   : > { %566 = vmax.xlane.f32.xlu0 %v565_v60 }
 0x259   : > { %v568_v61 = vsel %vm338_vm2, %v546_v58, -inf }
 0x25a   : > { %569 = vmax.xlane.f32.xlu1 %v568_v61 }
 0x2cd   : > { %v549_v62 = vpop.xlane.xlu1 %548 }
 0x2ce   : > { %v571_v63 = vsub.f32 %v539_v31, %v549_v62 }
 0x2cf   : > { %v552_v0 = vpop.xlane.xlu0 %551 }
 0x2d0   : > { %v579_v1 = vmul.f32 1.442695, %v571_v63  ;;  %v572_v2 = vsub.f32 %v540_v34, %v552_v0 }
 0x2d2   : > { %1165 = vpow2.f32 %v579_v1  ;;  %v581_v3 = vmul.f32 1.442695, %v572_v2 }
 0x2d4   : > { %1167 = vpow2.f32 %v581_v3 }
 0x2d5   : > { %v555_v4 = vpop.xlane.xlu0 %554 }
 0x2d6   : > { %v573_v5 = vsub.f32 %v541_v39, %v555_v4 }
 0x2d7   : > { %v558_v6 = vpop.xlane.xlu1 %557 }
 0x2d8   : > { %v583_v7 = vmul.f32 1.442695, %v573_v5  ;;  %v574_v8 = vsub.f32 %v542_v42, %v558_v6 }
 0x2da   : > { %1169 = vpow2.f32 %v583_v7  ;;  %v585_v9 = vmul.f32 1.442695, %v574_v8 }
 0x2dc   : > { %v1166_v11 = vpop.eup %1165  ;;  %1171 = vpow2.f32 %v585_v9 }
 0x2dd   : > { %v561_v12 = vpop.xlane.xlu0 %560  ;;  %v595_v13 = vsel %vm338_vm2, %v1166_v11, 0.0 }
 0x2de   : > { %v1168_v14 = vpop.eup %1167  ;;  %v575_v15 = vsub.f32 %v543_v47, %v561_v12  ;;  %596 = vadd.xlane.f32.xlu0 %v595_v13  ;;  %v1162_v12 = vld [vmem:[%s1396_s3 + $0x8] sm:$0xff]  }
 0x2df   : > { %v564_v17 = vpop.xlane.xlu1 %563  ;;  %v598_v18 = vsel %vm338_vm2, %v1168_v14, 0.0 }
 0x2e0   : > { %v587_v19 = vmul.f32 1.442695, %v575_v15  ;;  %v576_v20 = vsub.f32 %v544_v50, %v564_v17  ;;  %599 = vadd.xlane.f32.xlu1 %v598_v18  ;;  %v1163_v18 = vld [vmem:[%s1396_s3 + $0x10] sm:$0xff]  }
 0x2e2   : > { %1173 = vpow2.f32 %v587_v19  ;;  %v589_v21 = vmul.f32 1.442695, %v576_v20 }
 0x2e4   : > { %v1170_v22 = vpop.eup %1169  ;;  %1175 = vpow2.f32 %v589_v21 }
 0x2e5   : > { %v567_v23 = vpop.xlane.xlu0 %566  ;;  %v601_v24 = vsel %vm338_vm2, %v1170_v22, 0.0 }
 0x2e6   : > { %v1172_v25 = vpop.eup %1171  ;;  %v577_v26 = vsub.f32 %v545_v55, %v567_v23  ;;  %602 = vadd.xlane.f32.xlu0 %v601_v24 }
 0x2e7   : > { %v604_v27 = vsel %vm338_vm2, %v1172_v25, 0.0  ;;  %v570_v35 = vpop.xlane.xlu1 %569 }
 0x2e8   : > { %v591_v28 = vmul.f32 1.442695, %v577_v26  ;;  %605 = vadd.xlane.f32.xlu1 %v604_v27  ;;  %v578_v36 = vsub.f32 %v546_v58, %v570_v35 }
 0x2ea   : > { %1177 = vpow2.f32 %v591_v28  ;;  %v593_v37 = vmul.f32 1.442695, %v578_v36 }
 0x2ec   : > { %v1174_v29 = vpop.eup %1173  ;;  %1179 = vpow2.f32 %v593_v37 }
 0x2ed   : > { %v607_v30 = vsel %vm338_vm2, %v1174_v29, 0.0 }
 0x2ee   : > { %v1176_v31 = vpop.eup %1175  ;;  %608 = vadd.xlane.f32.xlu0 %v607_v30 }
 0x2ef   : > { %v610_v32 = vsel %vm338_vm2, %v1176_v31, 0.0 }
 0x2f0   : > { %611 = vadd.xlane.f32.xlu1 %v610_v32 }
 0x2f4   : > { %v1178_v33 = vpop.eup %1177 }
 0x2f5   : > { %v613_v34 = vsel %vm338_vm2, %v1178_v33, 0.0 }
 0x2f6   : > { %614 = vadd.xlane.f32.xlu0 %v613_v34  ;;  %v1180_v38 = vpop.eup %1179 }
 0x2f7   : > { %v616_v39 = vsel %vm338_vm2, %v1180_v38, 0.0 }
 0x301   : > { %731 = vrot.lane.b32.xlu1 %v1290_v16, %s1213_s23 }
 0x30c   : > { %684 = vrot.lane.b32.xlu0 %v1290_v16, %s1208_s16 }
 0x325   : > { %617 = vadd.xlane.f32.xlu1 %v616_v39 }
 0x336   : > { %778 = vrot.lane.b32.xlu1 %v1290_v16, %s1214_s24 }
 0x36b   : > { %v597_v40 = vpop.xlane.xlu0 %596 }
 0x36c   : > { %1181 = vrcp.f32 %v597_v40 }
 0x36d   : > { %v600_v41 = vpop.xlane.xlu1 %599 }
 0x36e   : > { %1183 = vrcp.f32 %v600_v41 }
 0x373   : > { %v603_v44 = vpop.xlane.xlu0 %602 }
 0x375   : > { %v606_v42 = vpop.xlane.xlu1 %605 }
 0x376   : > { %v1182_v43 = vpop.eup %1181  ;;  %1185 = vrcp.f32 %v606_v42 }
 0x377   : > { %v627_v46 = vmul.f32 %v1182_v43, %v1166_v11  ;;  %1187 = vrcp.f32 %v603_v44  ;;  %v1161_v11 = vld [vmem:[%s1396_s3] sm:$0xff]  }
 0x378   : > { %v1184_v45 = vpop.eup %1183 }
 0x379   : > { %v628_v47 = vmul.f32 %v1184_v45, %v1168_v14 }
 0x37b   : > { %v609_v48 = vpop.xlane.xlu0 %608  ;;  %v635_v49 = vpack.c.bf16 %v628_v47, %v627_v46  ;;  %v1026_v46 = vld [vmem:[%s1397_s4] ss:$0 sm:$0xff] }
 0x37c   : > { %1189 = vrcp.f32 %v609_v48 }
 0x37d   : > { %v612_v50 = vpop.xlane.xlu1 %611  ;;  %1082 = vmatmul.mubr.msk.bf16.vlgmr.msra.gmra.mrb[4].mxu0 %vm338_vm2, %v635_v49 }
 0x37e   : > { %1191 = vrcp.f32 %v612_v50  ;;  %1093 = vmatprep.mubr.msk.bf16.mxu0 %vm1207_vm1, %v1206_v10 }
 0x380   : > { %v1186_v51 = vpop.eup %1185 }
 0x381   : > { %v732_v16 = vpop.permute.xlu1 %731  ;;  %v1188_v53 = vpop.eup %1187  ;;  %v630_v54 = vmul.f32 %v1186_v51, %v1172_v25  ;;  %v1164_v25 = vld [vmem:[%s1396_s3 + $0x18] sm:$0xff]  }
 0x382   : > { %1092 = vmatpush3.bf16.msra.mxu0 %v732_v16  ;;  %v629_v56 = vmul.f32 %v1188_v53, %v1170_v22 }
 0x383   : > { %v615_v52 = vpop.xlane.xlu0 %614  ;;  %1103 = vmatprep.subr.bf16.mxu0 %v1206_v10 }
 0x384   : > { %v636_v61 = vpack.c.bf16 %v630_v54, %v629_v56  ;;  %1193 = vrcp.f32 %v615_v52 }
 0x386   : > { %v1190_v55 = vpop.eup %1189 }
 0x387   : > { %v685_v57 = vpop.permute.xlu0 %684  ;;  %v631_v59 = vmul.f32 %v1190_v55, %v1174_v29 }
 0x388   : > { %v1192_v58 = vpop.eup %1191  ;;  %1086 = vmatpush3.bf16.msra.mxu1 %v685_v57 }
 0x389   : > { %v632_v60 = vmul.f32 %v1192_v58, %v1176_v31  ;;  %1097 = vmatprep.subr.bf16.mxu1 %v1206_v10 }
 0x38b   : > { %1088 = vmatmul.mubr.msk.bf16.vlgmr.msra.gmra.mrb[16].mxu1 %vm338_vm2, %v636_v61  ;;  %v637_v62 = vpack.c.bf16 %v632_v60, %v631_v59 }
 0x38c   : > { %1099 = vmatprep.mubr.msk.bf16.mxu1 %vm1207_vm1, %v1206_v10 }
 0x38d   : > { %1094 = vmatmul.mubr.msk.bf16.vlgmr.msra.gmra.mrb[8].mxu0 %vm338_vm2, %v637_v62 }
 0x38e   : > { %1111 = vmatprep.mubr.msk.bf16.mxu0 %vm1207_vm1, %v1206_v10  ;;  %v1194_v1 = vpop.eup %1193  ;;  %1104 = vmatpush3.bf16.msra.mxu0 %v1161_v11 }
 0x38f   : > { %v633_v3 = vmul.f32 %v1194_v1, %v1178_v33  ;;  %1105 = vmatprep.subr.bf16.mxu0 %v1206_v10 }
 0x392   : > { %1106 = vmatpush3.bf16.msra.mxu0 %v1162_v12 }
 0x393   : > { %1107 = vmatprep.subr.bf16.mxu0 %v1206_v10 }
 0x396   : > { %1108 = vmatpush3.bf16.msra.mxu0 %v1163_v18 }
 0x397   : > { %1109 = vmatprep.subr.bf16.mxu0 %v1206_v10 }
 0x39a   : > { %1110 = vmatpush3.bf16.msra.mxu0 %v1164_v25 }
 0x3b2   : > { %v618_v63 = vpop.xlane.xlu1 %617 }
 0x3b3   : > { %1195 = vrcp.f32 %v618_v63 }
 0x3b6   : > { %v779_v0 = vpop.permute.xlu1 %778 }
 0x3b7   : > { %1098 = vmatpush3.bf16.msra.mxu1 %v779_v0 }
 0x3bd   : > { %v1196_v2 = vpop.eup %1195 }
 0x3be   : > { %v634_v4 = vmul.f32 %v1196_v2, %v1180_v38 }
 0x3c0   : > { %v638_v5 = vpack.c.bf16 %v634_v4, %v633_v3 }
 0x3c2   : > { %1100 = vmatmul.mubr.msk.bf16.vlgmr.msra.gmra.mrb[20].mxu1 %vm338_vm2, %v638_v5 }
 0x450   : > { %v676_v6 = vpop.f32.mrb[4].mxu0 }
 0x451   : > { %v1083_v7 = vpop.f32.mrb[5].mxu0 }
 0x452   : > { %v679_v8 = vpop.f32.mrb[6].mxu0 }
 0x453   : > { %v1084_v9 = vpop.f32.mrb[7].mxu0 }
 0x45e   : > { %v724_v13 = vpop.f32.mrb[16].mxu1 }
 0x45f   : > { %v1089_v14 = vpop.f32.mrb[17].mxu1 }
 0x460   : > { %v727_v15 = vpop.f32.mrb[18].mxu1  ;;  %v771_v17 = vpop.f32.mrb[8].mxu0 }
 0x461   : > { %v1133_v19 = vpack.i.bf16 %v727_v15, %v724_v13  ;;  %v1090_v20 = vpop.f32.mrb[19].mxu1  ;;  %v1095_v21 = vpop.f32.mrb[9].mxu0 }
 0x462   : > { %v774_v22 = vpop.f32.mrb[10].mxu0 }
 0x463   : > { %v1138_v23 = vpack.i.bf16 %v774_v22, %v771_v17  ;;  %1134 = vrot.lane.b32.xlu0 %v1133_v19, %s1212_s21  ;;  %v1096_v24 = vpop.f32.mrb[11].mxu0 }
 0x465   : > { %1139 = vrot.lane.b32.xlu1 %v1138_v23, %s1210_s19 }
 0x495   : > { %v818_v26 = vpop.f32.mrb[20].mxu1 }
 0x496   : > { %v1101_v27 = vpop.f32.mrb[21].mxu1 }
 0x497   : > { %v821_v28 = vpop.f32.mrb[22].mxu1 }
 0x498   : > { %v1143_v29 = vpack.i.bf16 %v821_v28, %v818_v26  ;;  %v1102_v30 = vpop.f32.mrb[23].mxu1 }
 0x49a   : > { %1144 = vrot.lane.b32.xlu0 %v1143_v29, %s1211_s20 }
 0x4d5   : > { %v1135_v31 = vpop.permute.xlu0 %1134 }
 0x4d6   : > { %v1137_v32 = vunpack.i.h.bf16 %v1135_v31  ;;  %v1136_v33 = vunpack.i.l.bf16 %v1135_v31 }
 0x4d7   : > { %v1140_v34 = vpop.permute.xlu1 %1139 }
 0x4d8   : > { %v1142_v35 = vunpack.i.h.bf16 %v1140_v34  ;;  %v1141_v36 = vunpack.i.l.bf16 %v1140_v34  ;;  %v849_v10 = vsel %vm338_vm2, %v676_v6, %v1136_v33  ;;  %v850_v37 = vsel %vm338_vm2, %v679_v8, %v1137_v32 }
 0x4da   : > { %v853_v41 = vsel %vm851_vm3, %v850_v37, %v1142_v35  ;;  %v852_v42 = vsel %vm851_vm3, %v849_v10, %v1141_v36 }
 0x50c   : > { %v1145_v38 = vpop.permute.xlu0 %1144 }
 0x50d   : > { %v1147_v39 = vunpack.i.h.bf16 %v1145_v38  ;;  %v1146_v40 = vunpack.i.l.bf16 %v1145_v38 }
 0x50f   : > { %v855_v43 = vsel %vm854_vm4, %v852_v42, %v1146_v40  ;;  %v856_v44 = vsel %vm854_vm4, %v853_v41, %v1147_v39 }
 0x510   : > { %v857_v45 = vpack.c.bf16 %v856_v44, %v855_v43 }
 0x512   : > { %1112 = vmatmul.mubr.msk.bf16.vlgmr.msra.gmra.mrb[12].mxu0 %vm284_vm0, %v857_v45 }
 0x5e5   : > { %v934_v47 = vpop.f32.mrb[12].mxu0 }
 0x5e6   : > { %v935_v48 = vadd.f32 %v1026_v46, %v934_v47  ;;  %v1113_v49 = vpop.f32.mrb[13].mxu0 }
 0x5e7   : > { %v937_v50 = vpop.f32.mrb[14].mxu0 }
 0x5e8   : > { %941 = vst.msk [vmem:[%s226_s17] sm:$0xff] %vm284_vm0, %v935_v48  ;;  %v938_v16 = vadd.f32 %v1026_v46, %v937_v50  ;;  %v1114_v51 = vpop.f32.mrb[15].mxu0 }
 0x5ea   : > { %942 = vst.msk [vmem:[%s226_s17 + $0x8] sm:$0xff] %vm284_vm0, %v938_v16 }
 0x5eb PF: > { %s15_s18 = sadd.s32 1, %s1203_s18  }
 0x5ec   : > { %p12_p4 = scmp.ge.s32.totalorder %s15_s18, 4  }
 0x5ee   :  { %14 = sbr.rel (!%p12_p4) target bundleno = 1 (0x1), region = 70 }

</bundles_post_ra>
